<compile_context>
chip_gen: v7x
topology: tpu7x:2x2x1
jax: 0.10.0
libtpu: 0.0.40
codegen_flags: <defaults>
</compile_context>

<pallas_src>
import jax
import jax.numpy as jnp
from jax.experimental import pallas as pl
from jax.experimental.pallas import tpu as pltpu  # noqa: F401

# Small, module-consistent sizes (n_embd divisible by n_head).
N_EMBD = 32
N_HEAD = 4
HEAD_SIZE = N_EMBD // N_HEAD
BATCH = 2
SEQ = 8           # block_size >= SEQ; causal mask built for SEQ
EPS = 1e-5        # nn.LayerNorm default


def _layernorm(h, g, b):
    mu = jnp.mean(h, axis=-1, keepdims=True)
    var = jnp.mean((h - mu) ** 2, axis=-1, keepdims=True)
    return (h - mu) * jax.lax.rsqrt(var + EPS) * g + b


def decoder_block_kernel(x_ref, ln1_g_ref, ln1_b_ref,
                         wq_ref, bq_ref, wk_ref, bk_ref, wv_ref, bv_ref,
                         wproj_ref, bproj_ref,
                         ln2_g_ref, ln2_b_ref,
                         w1_ref, b1_ref, w2_ref, b2_ref,
                         out_ref):
    x = x_ref[...]                     # (B*T, C) — whole batch, one invocation
    N = BATCH * SEQ
    T = SEQ

    # ---------------- x + MultiHeadAttention(ln1(x)) ----------------
    h1 = _layernorm(x, ln1_g_ref[...], ln1_b_ref[...])

    q = jnp.dot(h1, wq_ref[...], preferred_element_type=jnp.float32) + bq_ref[...]
    k = jnp.dot(h1, wk_ref[...], preferred_element_type=jnp.float32) + bk_ref[...]
    v = jnp.dot(h1, wv_ref[...], preferred_element_type=jnp.float32) + bv_ref[...]

    # Combined mask on the flattened (B*T, B*T) score grid: same batch AND
    # causal. Cross-batch entries get -inf -> exp() == 0, so the query-axis
    # softmax and the @V contraction are exactly the per-batch results.
    # Built once per invocation with comparisons only (no vector div/mod).
    row = jax.lax.broadcasted_iota(jnp.int32, (N, N), 0)
    col = jax.lax.broadcasted_iota(jnp.int32, (N, N), 1)
    same_batch = jnp.zeros((N, N), jnp.bool_)
    for b in range(BATCH):             # static, tiny
        in_b_r = (row >= b * T) & (row < (b + 1) * T)
        in_b_c = (col >= b * T) & (col < (b + 1) * T)
        same_batch = same_batch | (in_b_r & in_b_c)
    mask = same_batch & (col <= row)   # torch.tril(ones(T, T)) != 0, per batch

    # Accumulate each head straight into the output projection (no concat).
    sa = jnp.zeros((N, N_EMBD), jnp.float32)
    for h in range(N_HEAD):            # static head loop
        sl = slice(h * HEAD_SIZE, (h + 1) * HEAD_SIZE)
        qh, kh, vh = q[:, sl], k[:, sl], v[:, sl]
        # No 1/sqrt(head_size) scaling — matches reference module exactly.
        wei = jax.lax.dot_general(qh, kh, (((1,), (1,)), ((), ())),
                                  preferred_element_type=jnp.float32)   # (N, N)
        wei = jnp.where(mask, wei, -jnp.inf)
        # softmax over the *query* axis (dim=1 of (B, T, T)) == axis 0 here.
        m = jnp.max(wei, axis=0, keepdims=True)
        e = jnp.exp(wei - m)
        denom = jnp.sum(e, axis=0, keepdims=True)        # >= 1, never zero
        p = e * pl.reciprocal(denom, approx=True)        # EUP, ~free
        head_out = jnp.dot(p, vh, preferred_element_type=jnp.float32)   # (N, hs)
        sa = sa + jnp.dot(head_out, wproj_ref[sl, :],
                          preferred_element_type=jnp.float32)
    sa = sa + bproj_ref[...]

    x1 = x + sa

    # ---------------- x1 + FeedForward(ln2(x1)) ----------------
    h2 = _layernorm(x1, ln2_g_ref[...], ln2_b_ref[...])
    f = jnp.dot(h2, w1_ref[...], preferred_element_type=jnp.float32) + b1_ref[...]
    f = jnp.maximum(f, 0.0)                                           # ReLU
    f = jnp.dot(f, w2_ref[...], preferred_element_type=jnp.float32) + b2_ref[...]

    out_ref[...] = (x1 + f).astype(out_ref.dtype)


@jax.jit
def transformer_decoder_block(x, p):
    B, T, C = x.shape
    weights = [p["ln1_g"], p["ln1_b"],
               p["wq"], p["bq"], p["wk"], p["bk"], p["wv"], p["bv"],
               p["wproj"], p["bproj"],
               p["ln2_g"], p["ln2_b"],
               p["w1"], p["b1"], p["w2"], p["b2"]]

    # Single invocation, no grid: every input is mapped whole into VMEM
    # (default BlockSpec), so there is no per-step pipeline overhead and no
    # re-DMA / double-buffering of the resident weights.
    out2d = pl.pallas_call(
        decoder_block_kernel,
        out_shape=jax.ShapeDtypeStruct((B * T, C), x.dtype),
    )(x.reshape(B * T, C), *weights)
    return out2d.reshape(B, T, C)


def make_params(key):
    ks = jax.random.split(key, 12)
    s = 0.05
    C, H, F = N_EMBD, N_HEAD * HEAD_SIZE, 4 * N_EMBD
    return {
        "ln1_g": jnp.ones((1, C), jnp.float32),
        "ln1_b": jnp.zeros((1, C), jnp.float32),
        "wq": s * jax.random.normal(ks[0], (C, H), jnp.float32),
        "bq": s * jax.random.normal(ks[1], (1, H), jnp.float32),
        "wk": s * jax.random.normal(ks[2], (C, H), jnp.float32),
        "bk": s * jax.random.normal(ks[3], (1, H), jnp.float32),
        "wv": s * jax.random.normal(ks[4], (C, H), jnp.float32),
        "bv": s * jax.random.normal(ks[5], (1, H), jnp.float32),
        "wproj": s * jax.random.normal(ks[6], (H, C), jnp.float32),
        "bproj": s * jax.random.normal(ks[7], (1, C), jnp.float32),
        "ln2_g": jnp.ones((1, C), jnp.float32),
        "ln2_b": jnp.zeros((1, C), jnp.float32),
        "w1": s * jax.random.normal(ks[8], (C, F), jnp.float32),
        "b1": s * jax.random.normal(ks[9], (1, F), jnp.float32),
        "w2": s * jax.random.normal(ks[10], (F, C), jnp.float32),
        "b2": s * jax.random.normal(ks[11], (1, C), jnp.float32),
    }


def reference(x, p):
    def ln(h, g, b):
        mu = h.mean(-1, keepdims=True)
        var = ((h - mu) ** 2).mean(-1, keepdims=True)
        return (h - mu) / jnp.sqrt(var + EPS) * g + b

    B, T, C = x.shape
    h1 = ln(x, p["ln1_g"], p["ln1_b"])
    q = h1 @ p["wq"] + p["bq"]
    k = h1 @ p["wk"] + p["bk"]
    v = h1 @ p["wv"] + p["bv"]
    causal = jnp.tril(jnp.ones((T, T), bool))
    outs = []
    for h in range(N_HEAD):
        sl = slice(h * HEAD_SIZE, (h + 1) * HEAD_SIZE)
        wei = jnp.einsum("btd,bsd->bts", q[..., sl], k[..., sl])
        wei = jnp.where(causal[None], wei, -jnp.inf)
        wei = jax.nn.softmax(wei, axis=1)     # dim=1, matching the PyTorch module
        outs.append(jnp.einsum("bts,bsd->btd", wei, v[..., sl]))
    sa = jnp.concatenate(outs, axis=-1) @ p["wproj"] + p["bproj"]
    x1 = x + sa
    h2 = ln(x1, p["ln2_g"], p["ln2_b"])
    f = jnp.maximum(h2 @ p["w1"] + p["b1"], 0.0) @ p["w2"] + p["b2"]
    return x1 + f


if __name__ == "__main__":
    key = jax.random.PRNGKey(0)
    kx, kp = jax.random.split(key)
    x = jax.random.normal(kx, (BATCH, SEQ, N_EMBD), jnp.float32)
    params = make_params(kp)

    out = transformer_decoder_block(x, params)
    out = jax.block_until_ready(out)

    ref = reference(x, params)
    assert out.shape == (BATCH, SEQ, N_EMBD)
    max_err = float(jnp.max(jnp.abs(out - ref)))
    # Tolerance accounts for the approx=True (EUP) softmax reciprocal (~1e-4 rel).
    assert jnp.allclose(out, ref, atol=2e-3, rtol=2e-3), max_err
    print("KERNEL_OK")
</pallas_src>

<mosaic_0001>
module attributes {stable_mosaic.version = 11 : i64} {
  func.func @decoder_block_kernel(%arg0: memref<16x32xf32, #tpu.memory_space<vmem>>, %arg1: memref<1x32xf32, #tpu.memory_space<vmem>>, %arg2: memref<1x32xf32, #tpu.memory_space<vmem>>, %arg3: memref<32x32xf32, #tpu.memory_space<vmem>>, %arg4: memref<1x32xf32, #tpu.memory_space<vmem>>, %arg5: memref<32x32xf32, #tpu.memory_space<vmem>>, %arg6: memref<1x32xf32, #tpu.memory_space<vmem>>, %arg7: memref<32x32xf32, #tpu.memory_space<vmem>>, %arg8: memref<1x32xf32, #tpu.memory_space<vmem>>, %arg9: memref<32x32xf32, #tpu.memory_space<vmem>>, %arg10: memref<1x32xf32, #tpu.memory_space<vmem>>, %arg11: memref<1x32xf32, #tpu.memory_space<vmem>>, %arg12: memref<1x32xf32, #tpu.memory_space<vmem>>, %arg13: memref<32x128xf32, #tpu.memory_space<vmem>>, %arg14: memref<1x128xf32, #tpu.memory_space<vmem>>, %arg15: memref<128x32xf32, #tpu.memory_space<vmem>>, %arg16: memref<1x32xf32, #tpu.memory_space<vmem>>, %arg17: memref<16x32xf32, #tpu.memory_space<vmem>>) attributes {dimension_semantics = [], scalar_prefetch = 0 : i64, scratch_operands = 0 : i64, tpu.core_type = #tpu.core_type<tc>} {
    %c0 = arith.constant 0 : index
    %c0_0 = arith.constant 0 : index
    %0 = vector.load %arg0[%c0, %c0_0] : memref<16x32xf32, #tpu.memory_space<vmem>>, vector<16x32xf32>
    %c0_1 = arith.constant 0 : index
    %c0_2 = arith.constant 0 : index
    %1 = vector.load %arg1[%c0_1, %c0_2] : memref<1x32xf32, #tpu.memory_space<vmem>>, vector<1x32xf32>
    %c0_3 = arith.constant 0 : index
    %c0_4 = arith.constant 0 : index
    %2 = vector.load %arg2[%c0_3, %c0_4] : memref<1x32xf32, #tpu.memory_space<vmem>>, vector<1x32xf32>
    %cst = arith.constant dense<0.000000e+00> : vector<16xf32>
    %3 = vector.multi_reduction <add>, %0, %cst [1] : vector<16x32xf32> to vector<16xf32>
    %4 = vector.shape_cast %3 : vector<16xf32> to vector<16x1xf32>
    %cst_5 = arith.constant 3.200000e+01 : f32
    %5 = vector.broadcast %cst_5 : f32 to vector<16x1xf32>
    %6 = arith.divf %4, %5 : vector<16x1xf32>
    %7 = vector.broadcast %6 : vector<16x1xf32> to vector<16x32xf32>
    %8 = arith.subf %0, %7 : vector<16x32xf32>
    %9 = arith.mulf %8, %8 : vector<16x32xf32>
    %cst_6 = arith.constant dense<0.000000e+00> : vector<16xf32>
    %10 = vector.multi_reduction <add>, %9, %cst_6 [1] : vector<16x32xf32> to vector<16xf32>
    %11 = vector.shape_cast %10 : vector<16xf32> to vector<16x1xf32>
    %cst_7 = arith.constant 3.200000e+01 : f32
    %12 = vector.broadcast %cst_7 : f32 to vector<16x1xf32>
    %13 = arith.divf %11, %12 : vector<16x1xf32>
    %14 = vector.broadcast %6 : vector<16x1xf32> to vector<16x32xf32>
    %15 = arith.subf %0, %14 : vector<16x32xf32>
    %cst_8 = arith.constant 9.99999974E-6 : f32
    %16 = vector.broadcast %cst_8 : f32 to vector<16x1xf32>
    %17 = arith.addf %13, %16 : vector<16x1xf32>
    %18 = math.rsqrt %17 : vector<16x1xf32>
    %19 = vector.broadcast %18 : vector<16x1xf32> to vector<16x32xf32>
    %20 = arith.mulf %15, %19 : vector<16x32xf32>
    %21 = vector.broadcast %1 : vector<1x32xf32> to vector<16x32xf32>
    %22 = arith.mulf %20, %21 : vector<16x32xf32>
    %23 = vector.broadcast %2 : vector<1x32xf32> to vector<16x32xf32>
    %24 = arith.addf %22, %23 : vector<16x32xf32>
    %c0_9 = arith.constant 0 : index
    %c0_10 = arith.constant 0 : index
    %25 = vector.load %arg3[%c0_9, %c0_10] : memref<32x32xf32, #tpu.memory_space<vmem>>, vector<32x32xf32>
    %cst_11 = arith.constant dense<0.000000e+00> : vector<16x32xf32>
    %26 = tpu.matmul %24, %25, %cst_11 {dimension_numbers = #tpu.dot_dimension_numbers<[1], [0], [0], [1], [0, 0, 1, 1], [], []>} : vector<16x32xf32>, vector<32x32xf32>, vector<16x32xf32> -> vector<16x32xf32>
    %c0_12 = arith.constant 0 : index
    %c0_13 = arith.constant 0 : index
    %27 = vector.load %arg4[%c0_12, %c0_13] : memref<1x32xf32, #tpu.memory_space<vmem>>, vector<1x32xf32>
    %28 = vector.broadcast %27 : vector<1x32xf32> to vector<16x32xf32>
    %29 = arith.addf %26, %28 : vector<16x32xf32>
    %c0_14 = arith.constant 0 : index
    %c0_15 = arith.constant 0 : index
    %30 = vector.load %arg5[%c0_14, %c0_15] : memref<32x32xf32, #tpu.memory_space<vmem>>, vector<32x32xf32>
    %cst_16 = arith.constant dense<0.000000e+00> : vector<16x32xf32>
    %31 = tpu.matmul %24, %30, %cst_16 {dimension_numbers = #tpu.dot_dimension_numbers<[1], [0], [0], [1], [0, 0, 1, 1], [], []>} : vector<16x32xf32>, vector<32x32xf32>, vector<16x32xf32> -> vector<16x32xf32>
    %c0_17 = arith.constant 0 : index
    %c0_18 = arith.constant 0 : index
    %32 = vector.load %arg6[%c0_17, %c0_18] : memref<1x32xf32, #tpu.memory_space<vmem>>, vector<1x32xf32>
    %33 = vector.broadcast %32 : vector<1x32xf32> to vector<16x32xf32>
    %34 = arith.addf %31, %33 : vector<16x32xf32>
    %c0_19 = arith.constant 0 : index
    %c0_20 = arith.constant 0 : index
    %35 = vector.load %arg7[%c0_19, %c0_20] : memref<32x32xf32, #tpu.memory_space<vmem>>, vector<32x32xf32>
    %cst_21 = arith.constant dense<0.000000e+00> : vector<16x32xf32>
    %36 = tpu.matmul %24, %35, %cst_21 {dimension_numbers = #tpu.dot_dimension_numbers<[1], [0], [0], [1], [0, 0, 1, 1], [], []>} : vector<16x32xf32>, vector<32x32xf32>, vector<16x32xf32> -> vector<16x32xf32>
    %c0_22 = arith.constant 0 : index
    %c0_23 = arith.constant 0 : index
    %37 = vector.load %arg8[%c0_22, %c0_23] : memref<1x32xf32, #tpu.memory_space<vmem>>, vector<1x32xf32>
    %38 = vector.broadcast %37 : vector<1x32xf32> to vector<16x32xf32>
    %39 = arith.addf %36, %38 : vector<16x32xf32>
    %40 = tpu.iota {dimensions = array<i32: 0>} : vector<16x16xi32>
    %41 = tpu.iota {dimensions = array<i32: 1>} : vector<16x16xi32>
    %false = arith.constant false
    %42 = vector.broadcast %false : i1 to vector<16x16xi1>
    %c0_i32 = arith.constant 0 : i32
    %43 = vector.broadcast %c0_i32 : i32 to vector<16x16xi32>
    %44 = arith.cmpi sge, %40, %43 : vector<16x16xi32>
    %c8_i32 = arith.constant 8 : i32
    %45 = vector.broadcast %c8_i32 : i32 to vector<16x16xi32>
    %46 = arith.cmpi slt, %40, %45 : vector<16x16xi32>
    %47 = arith.andi %44, %46 : vector<16x16xi1>
    %c0_i32_24 = arith.constant 0 : i32
    %48 = vector.broadcast %c0_i32_24 : i32 to vector<16x16xi32>
    %49 = arith.cmpi sge, %41, %48 : vector<16x16xi32>
    %c8_i32_25 = arith.constant 8 : i32
    %50 = vector.broadcast %c8_i32_25 : i32 to vector<16x16xi32>
    %51 = arith.cmpi slt, %41, %50 : vector<16x16xi32>
    %52 = arith.andi %49, %51 : vector<16x16xi1>
    %53 = arith.andi %47, %52 : vector<16x16xi1>
    %54 = arith.ori %42, %53 : vector<16x16xi1>
    %c8_i32_26 = arith.constant 8 : i32
    %55 = vector.broadcast %c8_i32_26 : i32 to vector<16x16xi32>
    %56 = arith.cmpi sge, %40, %55 : vector<16x16xi32>
    %c16_i32 = arith.constant 16 : i32
    %57 = vector.broadcast %c16_i32 : i32 to vector<16x16xi32>
    %58 = arith.cmpi slt, %40, %57 : vector<16x16xi32>
    %59 = arith.andi %56, %58 : vector<16x16xi1>
    %c8_i32_27 = arith.constant 8 : i32
    %60 = vector.broadcast %c8_i32_27 : i32 to vector<16x16xi32>
    %61 = arith.cmpi sge, %41, %60 : vector<16x16xi32>
    %c16_i32_28 = arith.constant 16 : i32
    %62 = vector.broadcast %c16_i32_28 : i32 to vector<16x16xi32>
    %63 = arith.cmpi slt, %41, %62 : vector<16x16xi32>
    %64 = arith.andi %61, %63 : vector<16x16xi1>
    %65 = arith.andi %59, %64 : vector<16x16xi1>
    %66 = arith.ori %54, %65 : vector<16x16xi1>
    %67 = arith.cmpi sle, %41, %40 : vector<16x16xi32>
    %68 = arith.andi %66, %67 : vector<16x16xi1>
    %cst_29 = arith.constant 0.000000e+00 : f32
    %69 = vector.broadcast %cst_29 : f32 to vector<16x32xf32>
    %70 = vector.extract_strided_slice %29 {offsets = [0, 0], sizes = [16, 8], strides = [1, 1]} : vector<16x32xf32> to vector<16x8xf32>
    %71 = vector.extract_strided_slice %34 {offsets = [0, 0], sizes = [16, 8], strides = [1, 1]} : vector<16x32xf32> to vector<16x8xf32>
    %72 = vector.extract_strided_slice %39 {offsets = [0, 0], sizes = [16, 8], strides = [1, 1]} : vector<16x32xf32> to vector<16x8xf32>
    %cst_30 = arith.constant dense<0.000000e+00> : vector<16x16xf32>
    %73 = tpu.matmul %70, %71, %cst_30 {dimension_numbers = #tpu.dot_dimension_numbers<[1], [1], [0], [0], [0, 0, 1, 0], [], []>} : vector<16x8xf32>, vector<16x8xf32>, vector<16x16xf32> -> vector<16x16xf32>
    %cst_31 = arith.constant 0xFF800000 : f32
    %74 = vector.broadcast %cst_31 : f32 to vector<16x16xf32>
    %75 = arith.select %68, %73, %74 : vector<16x16xi1>, vector<16x16xf32>
    %cst_32 = arith.constant dense<0xFF800000> : vector<16xf32>
    %76 = vector.multi_reduction <maximumf>, %75, %cst_32 [0] : vector<16x16xf32> to vector<16xf32>
    %77 = vector.shape_cast %76 : vector<16xf32> to vector<1x16xf32>
    %78 = vector.broadcast %77 : vector<1x16xf32> to vector<16x16xf32>
    %79 = arith.subf %75, %78 : vector<16x16xf32>
    %80 = math.exp %79 : vector<16x16xf32>
    %cst_33 = arith.constant dense<0.000000e+00> : vector<16xf32>
    %81 = vector.multi_reduction <add>, %80, %cst_33 [0] : vector<16x16xf32> to vector<16xf32>
    %82 = vector.shape_cast %81 : vector<16xf32> to vector<1x16xf32>
    %83 = tpu.reciprocal %82 {approx = true} : vector<1x16xf32> -> vector<1x16xf32>
    %84 = vector.broadcast %83 : vector<1x16xf32> to vector<16x16xf32>
    %85 = arith.mulf %80, %84 : vector<16x16xf32>
    %cst_34 = arith.constant dense<0.000000e+00> : vector<16x8xf32>
    %86 = tpu.matmul %85, %72, %cst_34 {dimension_numbers = #tpu.dot_dimension_numbers<[1], [0], [0], [1], [0, 0, 1, 1], [], []>} : vector<16x16xf32>, vector<16x8xf32>, vector<16x8xf32> -> vector<16x8xf32>
    %c0_35 = arith.constant 0 : index
    %c0_36 = arith.constant 0 : index
    %87 = vector.load %arg9[%c0_35, %c0_36] : memref<32x32xf32, #tpu.memory_space<vmem>>, vector<8x32xf32>
    %cst_37 = arith.constant dense<0.000000e+00> : vector<16x32xf32>
    %88 = tpu.matmul %86, %87, %cst_37 {dimension_numbers = #tpu.dot_dimension_numbers<[1], [0], [0], [1], [0, 0, 1, 1], [], []>} : vector<16x8xf32>, vector<8x32xf32>, vector<16x32xf32> -> vector<16x32xf32>
    %89 = arith.addf %69, %88 : vector<16x32xf32>
    %90 = vector.extract_strided_slice %29 {offsets = [0, 8], sizes = [16, 8], strides = [1, 1]} : vector<16x32xf32> to vector<16x8xf32>
    %91 = vector.extract_strided_slice %34 {offsets = [0, 8], sizes = [16, 8], strides = [1, 1]} : vector<16x32xf32> to vector<16x8xf32>
    %92 = vector.extract_strided_slice %39 {offsets = [0, 8], sizes = [16, 8], strides = [1, 1]} : vector<16x32xf32> to vector<16x8xf32>
    %cst_38 = arith.constant dense<0.000000e+00> : vector<16x16xf32>
    %93 = tpu.matmul %90, %91, %cst_38 {dimension_numbers = #tpu.dot_dimension_numbers<[1], [1], [0], [0], [0, 0, 1, 0], [], []>} : vector<16x8xf32>, vector<16x8xf32>, vector<16x16xf32> -> vector<16x16xf32>
    %cst_39 = arith.constant 0xFF800000 : f32
    %94 = vector.broadcast %cst_39 : f32 to vector<16x16xf32>
    %95 = arith.select %68, %93, %94 : vector<16x16xi1>, vector<16x16xf32>
    %cst_40 = arith.constant dense<0xFF800000> : vector<16xf32>
    %96 = vector.multi_reduction <maximumf>, %95, %cst_40 [0] : vector<16x16xf32> to vector<16xf32>
    %97 = vector.shape_cast %96 : vector<16xf32> to vector<1x16xf32>
    %98 = vector.broadcast %97 : vector<1x16xf32> to vector<16x16xf32>
    %99 = arith.subf %95, %98 : vector<16x16xf32>
    %100 = math.exp %99 : vector<16x16xf32>
    %cst_41 = arith.constant dense<0.000000e+00> : vector<16xf32>
    %101 = vector.multi_reduction <add>, %100, %cst_41 [0] : vector<16x16xf32> to vector<16xf32>
    %102 = vector.shape_cast %101 : vector<16xf32> to vector<1x16xf32>
    %103 = tpu.reciprocal %102 {approx = true} : vector<1x16xf32> -> vector<1x16xf32>
    %104 = vector.broadcast %103 : vector<1x16xf32> to vector<16x16xf32>
    %105 = arith.mulf %100, %104 : vector<16x16xf32>
    %cst_42 = arith.constant dense<0.000000e+00> : vector<16x8xf32>
    %106 = tpu.matmul %105, %92, %cst_42 {dimension_numbers = #tpu.dot_dimension_numbers<[1], [0], [0], [1], [0, 0, 1, 1], [], []>} : vector<16x16xf32>, vector<16x8xf32>, vector<16x8xf32> -> vector<16x8xf32>
    %c8 = arith.constant 8 : index
    %c0_43 = arith.constant 0 : index
    %107 = vector.load %arg9[%c8, %c0_43] : memref<32x32xf32, #tpu.memory_space<vmem>>, vector<8x32xf32>
    %cst_44 = arith.constant dense<0.000000e+00> : vector<16x32xf32>
    %108 = tpu.matmul %106, %107, %cst_44 {dimension_numbers = #tpu.dot_dimension_numbers<[1], [0], [0], [1], [0, 0, 1, 1], [], []>} : vector<16x8xf32>, vector<8x32xf32>, vector<16x32xf32> -> vector<16x32xf32>
    %109 = arith.addf %89, %108 : vector<16x32xf32>
    %110 = vector.extract_strided_slice %29 {offsets = [0, 16], sizes = [16, 8], strides = [1, 1]} : vector<16x32xf32> to vector<16x8xf32>
    %111 = vector.extract_strided_slice %34 {offsets = [0, 16], sizes = [16, 8], strides = [1, 1]} : vector<16x32xf32> to vector<16x8xf32>
    %112 = vector.extract_strided_slice %39 {offsets = [0, 16], sizes = [16, 8], strides = [1, 1]} : vector<16x32xf32> to vector<16x8xf32>
    %cst_45 = arith.constant dense<0.000000e+00> : vector<16x16xf32>
    %113 = tpu.matmul %110, %111, %cst_45 {dimension_numbers = #tpu.dot_dimension_numbers<[1], [1], [0], [0], [0, 0, 1, 0], [], []>} : vector<16x8xf32>, vector<16x8xf32>, vector<16x16xf32> -> vector<16x16xf32>
    %cst_46 = arith.constant 0xFF800000 : f32
    %114 = vector.broadcast %cst_46 : f32 to vector<16x16xf32>
    %115 = arith.select %68, %113, %114 : vector<16x16xi1>, vector<16x16xf32>
    %cst_47 = arith.constant dense<0xFF800000> : vector<16xf32>
    %116 = vector.multi_reduction <maximumf>, %115, %cst_47 [0] : vector<16x16xf32> to vector<16xf32>
    %117 = vector.shape_cast %116 : vector<16xf32> to vector<1x16xf32>
    %118 = vector.broadcast %117 : vector<1x16xf32> to vector<16x16xf32>
    %119 = arith.subf %115, %118 : vector<16x16xf32>
    %120 = math.exp %119 : vector<16x16xf32>
    %cst_48 = arith.constant dense<0.000000e+00> : vector<16xf32>
    %121 = vector.multi_reduction <add>, %120, %cst_48 [0] : vector<16x16xf32> to vector<16xf32>
    %122 = vector.shape_cast %121 : vector<16xf32> to vector<1x16xf32>
    %123 = tpu.reciprocal %122 {approx = true} : vector<1x16xf32> -> vector<1x16xf32>
    %124 = vector.broadcast %123 : vector<1x16xf32> to vector<16x16xf32>
    %125 = arith.mulf %120, %124 : vector<16x16xf32>
    %cst_49 = arith.constant dense<0.000000e+00> : vector<16x8xf32>
    %126 = tpu.matmul %125, %112, %cst_49 {dimension_numbers = #tpu.dot_dimension_numbers<[1], [0], [0], [1], [0, 0, 1, 1], [], []>} : vector<16x16xf32>, vector<16x8xf32>, vector<16x8xf32> -> vector<16x8xf32>
    %c16 = arith.constant 16 : index
    %c0_50 = arith.constant 0 : index
    %127 = vector.load %arg9[%c16, %c0_50] : memref<32x32xf32, #tpu.memory_space<vmem>>, vector<8x32xf32>
    %cst_51 = arith.constant dense<0.000000e+00> : vector<16x32xf32>
    %128 = tpu.matmul %126, %127, %cst_51 {dimension_numbers = #tpu.dot_dimension_numbers<[1], [0], [0], [1], [0, 0, 1, 1], [], []>} : vector<16x8xf32>, vector<8x32xf32>, vector<16x32xf32> -> vector<16x32xf32>
    %129 = arith.addf %109, %128 : vector<16x32xf32>
    %130 = vector.extract_strided_slice %29 {offsets = [0, 24], sizes = [16, 8], strides = [1, 1]} : vector<16x32xf32> to vector<16x8xf32>
    %131 = vector.extract_strided_slice %34 {offsets = [0, 24], sizes = [16, 8], strides = [1, 1]} : vector<16x32xf32> to vector<16x8xf32>
    %132 = vector.extract_strided_slice %39 {offsets = [0, 24], sizes = [16, 8], strides = [1, 1]} : vector<16x32xf32> to vector<16x8xf32>
    %cst_52 = arith.constant dense<0.000000e+00> : vector<16x16xf32>
    %133 = tpu.matmul %130, %131, %cst_52 {dimension_numbers = #tpu.dot_dimension_numbers<[1], [1], [0], [0], [0, 0, 1, 0], [], []>} : vector<16x8xf32>, vector<16x8xf32>, vector<16x16xf32> -> vector<16x16xf32>
    %cst_53 = arith.constant 0xFF800000 : f32
    %134 = vector.broadcast %cst_53 : f32 to vector<16x16xf32>
    %135 = arith.select %68, %133, %134 : vector<16x16xi1>, vector<16x16xf32>
    %cst_54 = arith.constant dense<0xFF800000> : vector<16xf32>
    %136 = vector.multi_reduction <maximumf>, %135, %cst_54 [0] : vector<16x16xf32> to vector<16xf32>
    %137 = vector.shape_cast %136 : vector<16xf32> to vector<1x16xf32>
    %138 = vector.broadcast %137 : vector<1x16xf32> to vector<16x16xf32>
    %139 = arith.subf %135, %138 : vector<16x16xf32>
    %140 = math.exp %139 : vector<16x16xf32>
    %cst_55 = arith.constant dense<0.000000e+00> : vector<16xf32>
    %141 = vector.multi_reduction <add>, %140, %cst_55 [0] : vector<16x16xf32> to vector<16xf32>
    %142 = vector.shape_cast %141 : vector<16xf32> to vector<1x16xf32>
    %143 = tpu.reciprocal %142 {approx = true} : vector<1x16xf32> -> vector<1x16xf32>
    %144 = vector.broadcast %143 : vector<1x16xf32> to vector<16x16xf32>
    %145 = arith.mulf %140, %144 : vector<16x16xf32>
    %cst_56 = arith.constant dense<0.000000e+00> : vector<16x8xf32>
    %146 = tpu.matmul %145, %132, %cst_56 {dimension_numbers = #tpu.dot_dimension_numbers<[1], [0], [0], [1], [0, 0, 1, 1], [], []>} : vector<16x16xf32>, vector<16x8xf32>, vector<16x8xf32> -> vector<16x8xf32>
    %c24 = arith.constant 24 : index
    %c0_57 = arith.constant 0 : index
    %147 = vector.load %arg9[%c24, %c0_57] : memref<32x32xf32, #tpu.memory_space<vmem>>, vector<8x32xf32>
    %cst_58 = arith.constant dense<0.000000e+00> : vector<16x32xf32>
    %148 = tpu.matmul %146, %147, %cst_58 {dimension_numbers = #tpu.dot_dimension_numbers<[1], [0], [0], [1], [0, 0, 1, 1], [], []>} : vector<16x8xf32>, vector<8x32xf32>, vector<16x32xf32> -> vector<16x32xf32>
    %149 = arith.addf %129, %148 : vector<16x32xf32>
    %c0_59 = arith.constant 0 : index
    %c0_60 = arith.constant 0 : index
    %150 = vector.load %arg10[%c0_59, %c0_60] : memref<1x32xf32, #tpu.memory_space<vmem>>, vector<1x32xf32>
    %151 = vector.broadcast %150 : vector<1x32xf32> to vector<16x32xf32>
    %152 = arith.addf %149, %151 : vector<16x32xf32>
    %153 = arith.addf %0, %152 : vector<16x32xf32>
    %c0_61 = arith.constant 0 : index
    %c0_62 = arith.constant 0 : index
    %154 = vector.load %arg11[%c0_61, %c0_62] : memref<1x32xf32, #tpu.memory_space<vmem>>, vector<1x32xf32>
    %c0_63 = arith.constant 0 : index
    %c0_64 = arith.constant 0 : index
    %155 = vector.load %arg12[%c0_63, %c0_64] : memref<1x32xf32, #tpu.memory_space<vmem>>, vector<1x32xf32>
    %cst_65 = arith.constant dense<0.000000e+00> : vector<16xf32>
    %156 = vector.multi_reduction <add>, %153, %cst_65 [1] : vector<16x32xf32> to vector<16xf32>
    %157 = vector.shape_cast %156 : vector<16xf32> to vector<16x1xf32>
    %cst_66 = arith.constant 3.200000e+01 : f32
    %158 = vector.broadcast %cst_66 : f32 to vector<16x1xf32>
    %159 = arith.divf %157, %158 : vector<16x1xf32>
    %160 = vector.broadcast %159 : vector<16x1xf32> to vector<16x32xf32>
    %161 = arith.subf %153, %160 : vector<16x32xf32>
    %162 = arith.mulf %161, %161 : vector<16x32xf32>
    %cst_67 = arith.constant dense<0.000000e+00> : vector<16xf32>
    %163 = vector.multi_reduction <add>, %162, %cst_67 [1] : vector<16x32xf32> to vector<16xf32>
    %164 = vector.shape_cast %163 : vector<16xf32> to vector<16x1xf32>
    %cst_68 = arith.constant 3.200000e+01 : f32
    %165 = vector.broadcast %cst_68 : f32 to vector<16x1xf32>
    %166 = arith.divf %164, %165 : vector<16x1xf32>
    %167 = vector.broadcast %159 : vector<16x1xf32> to vector<16x32xf32>
    %168 = arith.subf %153, %167 : vector<16x32xf32>
    %cst_69 = arith.constant 9.99999974E-6 : f32
    %169 = vector.broadcast %cst_69 : f32 to vector<16x1xf32>
    %170 = arith.addf %166, %169 : vector<16x1xf32>
    %171 = math.rsqrt %170 : vector<16x1xf32>
    %172 = vector.broadcast %171 : vector<16x1xf32> to vector<16x32xf32>
    %173 = arith.mulf %168, %172 : vector<16x32xf32>
    %174 = vector.broadcast %154 : vector<1x32xf32> to vector<16x32xf32>
    %175 = arith.mulf %173, %174 : vector<16x32xf32>
    %176 = vector.broadcast %155 : vector<1x32xf32> to vector<16x32xf32>
    %177 = arith.addf %175, %176 : vector<16x32xf32>
    %c0_70 = arith.constant 0 : index
    %c0_71 = arith.constant 0 : index
    %178 = vector.load %arg13[%c0_70, %c0_71] : memref<32x128xf32, #tpu.memory_space<vmem>>, vector<32x128xf32>
    %cst_72 = arith.constant dense<0.000000e+00> : vector<16x128xf32>
    %179 = tpu.matmul %177, %178, %cst_72 {dimension_numbers = #tpu.dot_dimension_numbers<[1], [0], [0], [1], [0, 0, 1, 1], [], []>} : vector<16x32xf32>, vector<32x128xf32>, vector<16x128xf32> -> vector<16x128xf32>
    %c0_73 = arith.constant 0 : index
    %c0_74 = arith.constant 0 : index
    %180 = vector.load %arg14[%c0_73, %c0_74] : memref<1x128xf32, #tpu.memory_space<vmem>>, vector<1x128xf32>
    %181 = vector.broadcast %180 : vector<1x128xf32> to vector<16x128xf32>
    %182 = arith.addf %179, %181 : vector<16x128xf32>
    %cst_75 = arith.constant 0.000000e+00 : f32
    %183 = vector.broadcast %cst_75 : f32 to vector<16x128xf32>
    %184 = arith.maximumf %182, %183 : vector<16x128xf32>
    %c0_76 = arith.constant 0 : index
    %c0_77 = arith.constant 0 : index
    %185 = vector.load %arg15[%c0_76, %c0_77] : memref<128x32xf32, #tpu.memory_space<vmem>>, vector<128x32xf32>
    %cst_78 = arith.constant dense<0.000000e+00> : vector<16x32xf32>
    %186 = tpu.matmul %184, %185, %cst_78 {dimension_numbers = #tpu.dot_dimension_numbers<[1], [0], [0], [1], [0, 0, 1, 1], [], []>} : vector<16x128xf32>, vector<128x32xf32>, vector<16x32xf32> -> vector<16x32xf32>
    %c0_79 = arith.constant 0 : index
    %c0_80 = arith.constant 0 : index
    %187 = vector.load %arg16[%c0_79, %c0_80] : memref<1x32xf32, #tpu.memory_space<vmem>>, vector<1x32xf32>
    %188 = vector.broadcast %187 : vector<1x32xf32> to vector<16x32xf32>
    %189 = arith.addf %186, %188 : vector<16x32xf32>
    %190 = arith.addf %153, %189 : vector<16x32xf32>
    %c0_81 = arith.constant 0 : index
    %c0_82 = arith.constant 0 : index
    %191 = vector.load %arg17[%c0_81, %c0_82] : memref<16x32xf32, #tpu.memory_space<vmem>>, vector<16x32xf32>
    tpu.vector_store %arg17[%c0_81, %c0_82], %190 {strides = array<i32>} : memref<16x32xf32, #tpu.memory_space<vmem>>, vector<16x32xf32>,
    return
  }
}

</mosaic_0001>

<bundles_post_ra>
// kernel: transformer_decoder_block.1
= control target key start
LH: loop header
LB: loop body
LE: loop exit
PB: predicated region body
PF: predicated region fallthrough
CT: control target
= control target key end

     0   :  { %s2798_s0 = inlined_call_operand.hbm [shape: f32[16,32], index: 0, kind: input, shape index: {}]   ;;  %s2799_s1 = inlined_call_operand.vmem [shape: f32[1,32], index: 1, kind: input, shape index: {}]   ;;  %s2800_s2 = inlined_call_operand.vmem [shape: f32[1,32], index: 2, kind: input, shape index: {}]   ;;  %s2801_s3 = inlined_call_operand.vmem [shape: f32[32,32], index: 3, kind: input, shape index: {}]   ;;  %s2802_s4 = inlined_call_operand.vmem [shape: f32[1,32], index: 4, kind: input, shape index: {}]   ;;  %s2803_s5 = inlined_call_operand.vmem [shape: f32[32,32], index: 5, kind: input, shape index: {}]   ;;  %s2804_s6 = inlined_call_operand.vmem [shape: f32[1,32], index: 6, kind: input, shape index: {}]   ;;  %s2805_s7 = inlined_call_operand.vmem [shape: f32[32,32], index: 7, kind: input, shape index: {}]   ;;  %s2806_s8 = inlined_call_operand.vmem [shape: f32[1,32], index: 8, kind: input, shape index: {}]   ;;  %s2807_s9 = inlined_call_operand.vmem [shape: f32[32,32], index: 9, kind: input, shape index: {}]   ;;  %s2808_s10 = inlined_call_operand.vmem [shape: f32[1,32], index: 10, kind: input, shape index: {}]   ;;  %s2809_s11 = inlined_call_operand.vmem [shape: f32[1,32], index: 11, kind: input, shape index: {}]   ;;  %s2810_s12 = inlined_call_operand.vmem [shape: f32[1,32], index: 12, kind: input, shape index: {}]   ;;  %s2811_s13 = inlined_call_operand.vmem [shape: f32[32,128], index: 13, kind: input, shape index: {}]   ;;  %s2812_s14 = inlined_call_operand.hbm [shape: f32[1,128], index: 14, kind: input, shape index: {}]   ;;  %s2813_s15 = inlined_call_operand.vmem [shape: f32[128,32], index: 15, kind: input, shape index: {}]   ;;  %s2814_s16 = inlined_call_operand.vmem [shape: f32[1,32], index: 16, kind: input, shape index: {}]   ;;  %s2815_s17 = inlined_call_operand.hbm [shape: f32[16,32], index: 17, kind: output, shape index: {}]  }
   0x1   :  { %2818 = sst [smem:[#allocation11_spill]] %s2798_s0 }
   0x2   :  { %2819 = sst [smem:[#allocation12_spill]] %s2799_s1 }
   0x3   :  { %2820 = sst [smem:[#allocation13_spill]] %s2815_s17 }
   0x4   :  { %22 = vsyncpa [#allocation3], 0 }
   0x5   :  { %23 = vsyncpa [#allocation6], 0 }
   0x6   :  { %24 = vsyncpa [#allocation4], 0  ;;  %s2394_s24 = smov [#allocation2]   ;;  %s2821_s28 = sld [smem:[#allocation11_spill]] }
   0x7   :  { %s30_s25 = sshll.u32 %s2394_s24, 4  ;;  %s31_s25 = int_to_ptr.vmem [resolvable:$true] %s30_s25 }
   0xc   :  { %s2322_s29 = scalar_lea.hbm %s2821_s28, 256 }
   0xd   :  { %p2323_p0 = scmp.ne.s32.totalorder %s2821_s28, %s2322_s29  ;;  %p2326_p1 = scmp.lt.u32.totalorder %s2322_s29, %s2821_s28 }
   0xf   :  { %p2328_p2 = pnand %p2326_p1, %p2323_p0 }
  0x11   :  { %2331 = shalt.err (!%p2328_p2)
}
  0x12   :  { %s2332_s1 = scalar_lea.vmem %s31_s25, 256  ;;  %p2337_p4 = scmp.lt.s32.totalorder %s31_s25, %s31_s25 }
  0x13   :  { %p2333_p3 = scmp.ne.s32.totalorder %s31_s25, %s2332_s1  ;;  %p2338_p5 = scmp.lt.s32.totalorder %s2332_s1, %s2332_s1 }
  0x15   :  { %p2339_p6 = por %p2338_p5, %p2337_p4 }
  0x17   :  { %p2340_p7 = pnand %p2339_p6, %p2333_p3 }
  0x19   :  { %2343 = shalt.err (!%p2340_p7)
}
  0x1a   :  { %s2395_s20 = smov 128   ;;  %s2396_s21 = smov 8  }
  0x1b   :  { %36 = dma.hbm_to_vmem [thread:$0]  %s2821_s28, 256, %s31_s25, [#allocation3], %s2395_s20, %s2395_s20, %s2396_s21  }
  0x1c   :  { %s2397_s24 = smov [#allocation5]   ;;  %s2344_s0 = scalar_lea.hbm %s2812_s14, 16 }
  0x1d   :  { %s69_s26 = sshll.u32 %s2397_s24, 4  ;;  %p2345_p8 = scmp.ne.s32.totalorder %s2812_s14, %s2344_s0  ;;  %s70_s26 = int_to_ptr.vmem [resolvable:$true] %s69_s26 }
  0x1e   :  { %p2348_p9 = scmp.lt.u32.totalorder %s2344_s0, %s2812_s14 }
  0x20   :  { %p2350_p10 = pnand %p2348_p9, %p2345_p8 }
  0x22   :  { %2353 = shalt.err (!%p2350_p10)
}
  0x23   :  { %s2354_s17 = scalar_lea.vmem %s70_s26, 16  ;;  %s2358_s25 = scalar_lea.vmem %s70_s26, 32 }
  0x24   :  { %p2355_p11 = scmp.ne.s32.totalorder %s70_s26, %s2354_s17  ;;  %p2359_p12 = scmp.lt.s32.totalorder %s70_s26, %s70_s26 }
  0x25   :  { %p2360_p13 = scmp.lt.s32.totalorder %s2358_s25, %s2354_s17 }
  0x27   :  { %p2361_p0 = por %p2360_p13, %p2359_p12 }
  0x29   :  { %p2362_p1 = pnand %p2361_p0, %p2355_p11 }
  0x2b   :  { %2365 = shalt.err (!%p2362_p1)
}
  0x2c   :  { %72 = dma.hbm_to_vmem [thread:$0]  %s2812_s14, 16, %s70_s26, [#allocation6]  }
  0x2d   :  { %2388 = dma.done.wait [#allocation3], 256  }
  0x2e   :  { %2389 = vsyncadd [#allocation3], 4294967040 }
  0x2f   :  { %2390 = dma.done.wait [#allocation6], 16  }
  0x30   :  { %2391 = vsyncadd [#allocation6], 4294967280  ;;  %vm87_vm0 = vcmask 261120   ;;  %v2519_v0 = vld [vmem:[#allocation2] sm:$0xff]  ;;  %v2521_v1 = vld [vmem:[#allocation2 + $0x8] sm:$0xff]  ;;  %s2822_s28 = sld [smem:[#allocation12_spill]] }
  0x31   :  { %v88_v2 = vsel %vm87_vm0, %v2519_v0, 0.0  ;;  %v91_v3 = vsel %vm87_vm0, %v2521_v1, 0.0  ;;  %v131_v14 = vld [vmem:[%s2801_s3] sm:$0xff]  ;;  %v132_v15 = vld [vmem:[%s2801_s3 + $0x8] sm:$0xff]  ;;  %v133_v16 = vld [vmem:[%s2801_s3 + $0x10] sm:$0xff]  ;;  %vm428_vm1 = vcmask 64512  }
  0x32   :  { %89 = vadd.xlane.f32.xlu0 %v88_v2  ;;  %v2142_v17 = vpack.c.bf16 %v132_v15, %v131_v14  ;;  %v134_v18 = vld [vmem:[%s2801_s3 + $0x18] sm:$0xff]  ;;  %v223_v20 = vld [vmem:[%s2803_s5] sm:$0xff]  ;;  %v224_v21 = vld [vmem:[%s2803_s5 + $0x8] sm:$0xff]  ;;  %s2400_s14 = smov 104   ;;  %vm518_vm10 = vcmask 130048  }
  0x33   :  { %v2146_v19 = vpack.c.bf16 %v134_v18, %v133_v16  ;;  %v2150_v22 = vpack.c.bf16 %v224_v21, %v223_v20  ;;  %v1852_v32 = vld [vmem:[%s2800_s2] ss:$0 sm:$0xff]  ;;  %v225_v37 = vld [vmem:[%s2803_s5 + $0x10] sm:$0xff]  ;;  %v226_v38 = vld [vmem:[%s2803_s5 + $0x18] sm:$0xff] }
  0x34   :  { %2143 = vmatprep.subr.bf16.mxu1 %v2142_v17  ;;  %v2154_v41 = vpack.c.bf16 %v226_v38, %v225_v37  ;;  %v309_v42 = vld [vmem:[%s2805_s7] sm:$0xff]  ;;  %v310_v43 = vld [vmem:[%s2805_s7 + $0x8] sm:$0xff]  ;;  %v311_v45 = vld [vmem:[%s2805_s7 + $0x10] sm:$0xff] }
  0x35   :  { %2145 = vmatpush3.bf16.msra.mxu1 %v2142_v17  ;;  %v2158_v44 = vpack.c.bf16 %v310_v43, %v309_v42  ;;  %v312_v46 = vld [vmem:[%s2805_s7 + $0x18] sm:$0xff]  ;;  %v1853_v48 = vld [vmem:[%s2802_s4] ss:$0 sm:$0xff]  ;;  %s2398_s7 = smov 120   ;;  %vm2588_vm2 = vmpackc.low %vm428_vm1, %vm428_vm1 }
  0x36   :  { %92 = vadd.xlane.f32.xlu0 %v91_v3  ;;  %2147 = vmatprep.subr.bf16.mxu1 %v2146_v19  ;;  %v1851_v30 = vld [vmem:[%s2822_s28] ss:$0 sm:$0xff]  ;;  %v2162_v47 = vpack.c.bf16 %v312_v46, %v311_v45 }
  0x37   :  { %v1856_v53 = vld [vmem:[%s2804_s6] ss:$0 sm:$0xff]  ;;  %s2399_s6 = smov 112  }
  0x38   :  { %v1859_v61 = vld [vmem:[%s2806_s8] ss:$0 sm:$0xff] }
  0x39   :  { %2149 = vmatpush3.bf16.msra.mxu1 %v2146_v19 }
  0x3a   :  { %2151 = vmatprep.subr.bf16.mxu1 %v2150_v22 }
  0xbf   :  { %v90_v4 = vpop.xlane.xlu0 %89 }
  0xc0   :  { %v95_v5 = vmul.f32 0.03125, %v90_v4 }
  0xc2   :  { %v97_v6 = vsub.f32 %v2519_v0, %v95_v5 }
  0xc3   :  { %v93_v7 = vpop.xlane.xlu0 %92 }
  0xc4   :  { %v96_v8 = vmul.f32 0.03125, %v93_v7  ;;  %v99_v9 = vmul.f32 %v97_v6, %v97_v6 }
  0xc6   :  { %v98_v10 = vsub.f32 %v2521_v1, %v96_v8  ;;  %v101_v11 = vsel %vm87_vm0, %v99_v9, 0.0 }
  0xc7   :  { %102 = vadd.xlane.f32.xlu1 %v101_v11 }
  0xc8   :  { %v100_v12 = vmul.f32 %v98_v10, %v98_v10 }
  0xca   :  { %v104_v13 = vsel %vm87_vm0, %v100_v12, 0.0 }
  0xcb   :  { %105 = vadd.xlane.f32.xlu1 %v104_v13 }
 0x154   :  { %v103_v23 = vpop.xlane.xlu1 %102 }
 0x155   :  { %v107_v24 = vmul.f32 0.03125, %v103_v23 }
 0x157   :  { %v109_v25 = vadd.f32 1e-05, %v107_v24 }
 0x158   :  { %v106_v26 = vpop.xlane.xlu1 %105 }
 0x159   :  { %2290 = vrsqrt.f32 %v109_v25  ;;  %v108_v27 = vmul.f32 0.03125, %v106_v26 }
 0x15b   :  { %v110_v28 = vadd.f32 1e-05, %v108_v27 }
 0x15d   :  { %2292 = vrsqrt.f32 %v110_v28  ;;  %v395_v28 = vlaneseq }
 0x163   :  { %v2291_v29 = vpop.eup %2290 }
 0x164   :  { %v113_v31 = vmul.f32 %v2291_v29, %v97_v6  ;;  %v396_v29 = vshrl.u32 %v395_v28, 7 }
 0x166   :  { %v121_v33 = vmul.f32 %v1851_v30, %v113_v31  ;;  %v397_v31 = vadd.s32 8, %v396_v29 }
 0x167   :  { %v2293_v34 = vpop.eup %2292 }
 0x168   :  { %v114_v35 = vmul.f32 %v2293_v34, %v98_v10  ;;  %v129_v36 = vadd.f32 %v1852_v32, %v121_v33  ;;  %v837_v33 = vld [vmem:[%s2807_s9 + $0x8] sm:$0xff] }
 0x16a   :  { %v122_v39 = vmul.f32 %v1851_v30, %v114_v35  ;;  %1995 = vmatprep.mubr.msk.f32.mxu1 %vm87_vm0, %v129_v36  ;;  %v399_v30 = vand.u32 127, %v395_v28 }
 0x16c   :  { %v130_v40 = vadd.f32 %v1852_v32, %v122_v39  ;;  %vm417_vm3 = vcmp.ge.s32.totalorder %v399_v30, 8  ;;  %vm418_vm4 = vcmp.lt.s32.totalorder %v399_v30, 16  ;;  %vm425_vm6 = vcmp.le.s32.totalorder %v399_v30, %v397_v31 }
 0x16d   :  { %vm419_vm5 = vmand %vm417_vm3, %vm418_vm4  ;;  %vm407_vm7 = vcmp.lt.s32.totalorder %v399_v30, 8  ;;  %vm424_vm8 = vcmp.le.s32.totalorder %v399_v30, %v396_v29 }
 0x16e   :  { %1996 = vmatmul.mubr.msk.f32.vlgmr.msra.gmra.mrb[0].mxu1 %vm87_vm0, %v130_v40  ;;  %vm2618_vm9 = vmand %vm419_vm5, %vm425_vm6 }
 0x16f   :  { %2153 = vmatpush3.bf16.msra.mxu1 %v2150_v22  ;;  %2006 = vmatprep.mubr.msk.f32.mxu1 %vm87_vm0, %v129_v36  ;;  %vm2622_vm11 = vmand %vm407_vm7, %vm424_vm8 }
 0x170   :  { %2155 = vmatprep.subr.bf16.mxu1 %v2154_v41 }
 0x173   :  { %2157 = vmatpush3.bf16.msra.mxu1 %v2154_v41 }
 0x174   :  { %2159 = vmatprep.subr.bf16.mxu1 %v2158_v44 }
 0x176   :  { %2007 = vmatmul.mubr.msk.f32.vlgmr.msra.gmra.mrb[2].mxu1 %vm87_vm0, %v130_v40 }
 0x177   :  { %2161 = vmatpush3.bf16.msra.mxu1 %v2158_v44  ;;  %2017 = vmatprep.mubr.msk.f32.mxu1 %vm87_vm0, %v129_v36 }
 0x178   :  { %2163 = vmatprep.subr.bf16.mxu1 %v2162_v47 }
 0x17b   :  { %2165 = vmatpush3.bf16.msra.mxu1 %v2162_v47 }
 0x17e   :  { %2018 = vmatmul.mubr.msk.f32.vlgmr.msra.gmra.mrb[4].mxu1 %vm87_vm0, %v130_v40 }
 0x241   :  { %v1997_v49 = vpop.f32.mrb[0].mxu1 }
 0x242   :  { %v214_v50 = vpop.f32.mrb[1].mxu1  ;;  %v220_v52 = vadd.f32 %v1997_v49, %v1853_v48 }
 0x243   :  { %v215_v51 = vadd.f32 %v1853_v48, %v214_v50 }
 0x245   :  { %628 = vrot.lane.b32.xlu1 %v215_v51, %s2398_s7  ;;  %2024 = vmatprep.mubr.msk.f32.mxu1 %vm428_vm1, %v215_v51 }
 0x249   :  { %v2008_v54 = vpop.f32.mrb[2].mxu1  ;;  %630 = vrot.lane.b32.xlu1 %v220_v52, %s2398_s7 }
 0x24a   :  { %v306_v55 = vadd.f32 %v2008_v54, %v1856_v53  ;;  %v300_v56 = vpop.f32.mrb[3].mxu1 }
 0x24b   :  { %v301_v57 = vadd.f32 %v1856_v53, %v300_v56 }
 0x24d   :  { %v2260_v59 = vpack.i.bf16 %v306_v55, %v301_v57  ;;  %v2166_v60 = vpack.c.bf16 %v306_v55, %v301_v57 }
 0x24f   :  { %2261 = vrot.lane.b32.xlu0 %v2260_v59, %s2398_s7  ;;  %2168 = vmatprep.subr.msk.bf16.mxu1 %vm2588_vm2, %v2166_v60 }
 0x250   :  { %2266 = vrot.lane.b32.xlu1 %v2260_v59, %s2399_s6  ;;  %2171 = vmatpush3.bf16.xpose.msk.msra.mxu1 %vm2588_vm2, %v2166_v60 }
 0x251   :  { %v2019_v62 = vpop.f32.mrb[4].mxu1 }
 0x252   :  { %v392_v63 = vadd.f32 %v2019_v62, %v1859_v61  ;;  %v386_v2 = vpop.f32.mrb[5].mxu1 }
 0x253   :  { %v387_v3 = vadd.f32 %v1859_v61, %v386_v2  ;;  %1000 = vrot.lane.b32.xlu0 %v215_v51, %s2399_s6 }
 0x254   :  { %1002 = vrot.lane.b32.xlu1 %v220_v52, %s2399_s6 }
 0x255   :  { %v2172_v4 = vpack.c.bf16 %v392_v63, %v387_v3  ;;  %v2270_v5 = vpack.i.bf16 %v392_v63, %v387_v3 }
 0x257   :  { %2173 = vmatprep.subr.bf16.mxu0 %v2172_v4  ;;  %2271 = vrot.lane.b32.xlu0 %v2270_v5, %s2398_s7 }
 0x258   :  { %2276 = vrot.lane.b32.xlu1 %v2260_v59, %s2400_s14  ;;  %2025 = vmatmul.mubr.msk.f32.vlgmr.msra.gmra.mrb[6].mxu1 %vm428_vm1, %v220_v52 }
 0x259   :  { %2175 = vmatpush3.bf16.msra.mxu0 %v2172_v4 }
 0x25b   :  { %1291 = vrot.lane.b32.xlu0 %v215_v51, %s2400_s14 }
 0x25c   :  { %1293 = vrot.lane.b32.xlu1 %v220_v52, %s2400_s14 }
 0x25f   :  { %2281 = vrot.lane.b32.xlu0 %v2270_v5, %s2399_s6 }
 0x260   :  { %2286 = vrot.lane.b32.xlu1 %v2270_v5, %s2400_s14 }
 0x2b7   :  { %v629_v6 = vpop.permute.xlu1 %628 }
 0x2b8   :  { %2038 = vmatprep.mubr.msk.f32.mxu1 %vm428_vm1, %v629_v6 }
 0x2bb   :  { %v631_v7 = vpop.permute.xlu1 %630 }
 0x2c1   :  { %v2262_v8 = vpop.permute.xlu0 %2261 }
 0x2c2   :  { %v2264_v9 = vunpack.i.h.bf16 %v2262_v8  ;;  %v2263_v10 = vunpack.i.l.bf16 %v2262_v8  ;;  %v2267_v11 = vpop.permute.xlu1 %2266 }
 0x2c3   :  { %v2269_v12 = vunpack.i.h.bf16 %v2267_v11  ;;  %v2268_v13 = vunpack.i.l.bf16 %v2267_v11 }
 0x2c4   :  { %v2176_v14 = vpack.c.bf16 %v2264_v9, %v2263_v10 }
 0x2c5   :  { %v1001_v15 = vpop.permute.xlu0 %1000  ;;  %v2186_v16 = vpack.c.bf16 %v2269_v12, %v2268_v13 }
 0x2c6   :  { %v1003_v17 = vpop.permute.xlu1 %1002  ;;  %2178 = vmatprep.subr.msk.bf16.mxu1 %vm2588_vm2, %v2176_v14 }
 0x2c7   :  { %2181 = vmatpush3.bf16.xpose.msk.msra.mxu1 %vm2588_vm2, %v2176_v14 }
 0x2c8   :  { %2188 = vmatprep.subr.msk.bf16.mxu1 %vm2588_vm2, %v2186_v16 }
 0x2c9   :  { %v2272_v18 = vpop.permute.xlu0 %2271 }
 0x2ca   :  { %v2274_v19 = vunpack.i.h.bf16 %v2272_v18  ;;  %v2273_v20 = vunpack.i.l.bf16 %v2272_v18  ;;  %v2277_v21 = vpop.permute.xlu1 %2276 }
 0x2cb   :  { %v2279_v22 = vunpack.i.h.bf16 %v2277_v21  ;;  %v2278_v23 = vunpack.i.l.bf16 %v2277_v21 }
 0x2cc   :  { %v2182_v24 = vpack.c.bf16 %v2274_v19, %v2273_v20 }
 0x2cd   :  { %v2196_v25 = vpack.c.bf16 %v2279_v22, %v2278_v23  ;;  %v1292_v26 = vpop.permute.xlu0 %1291 }
 0x2ce   :  { %2039 = vmatmul.mubr.msk.f32.vlgmr.msra.gmra.mrb[8].mxu1 %vm428_vm1, %v631_v7  ;;  %2183 = vmatprep.subr.bf16.mxu0 %v2182_v24  ;;  %v1294_v27 = vpop.permute.xlu1 %1293 }
 0x2cf   :  { %2191 = vmatpush3.bf16.xpose.msk.msra.mxu1 %vm2588_vm2, %v2186_v16  ;;  %2062 = vmatprep.mubr.msk.f32.mxu1 %vm428_vm1, %v1001_v15 }
 0x2d0   :  { %2198 = vmatprep.subr.msk.bf16.mxu1 %vm2588_vm2, %v2196_v25 }
 0x2d6   :  { %2063 = vmatmul.mubr.msk.f32.vlgmr.msra.gmra.mrb[10].mxu1 %vm428_vm1, %v1003_v17 }
 0x2d7   :  { %2201 = vmatpush3.bf16.xpose.msk.msra.mxu1 %vm2588_vm2, %v2196_v25  ;;  %2081 = vmatprep.mubr.msk.f32.mxu1 %vm428_vm1, %v1292_v26 }
 0x2de   :  { %2082 = vmatmul.mubr.msk.f32.vlgmr.msra.gmra.mrb[12].mxu1 %vm428_vm1, %v1294_v27 }
 0x32b   :  { %v2026_v34 = vpop.f32.mrb[6].mxu1 }
 0x32c   :  { %v517_v35 = vsel %vm2618_vm9, %v2026_v34, -inf  ;;  %v507_v36 = vpop.f32.mrb[7].mxu1 }
 0x32d   :  { %v520_v37 = vsel %vm518_vm10, %v517_v35, -inf  ;;  %v516_v38 = vsel %vm2622_vm11, %v507_v36, -inf }
 0x32e   :  { %v519_v39 = vsel %vm518_vm10, %v516_v38, -inf }
 0x32f   :  { %v521_v40 = vmax.f32 %v519_v39, %v520_v37 }
 0x331   :  { %v522_v41 = vrot.slane %v521_v40, 4 }
 0x333   :  { %v523_v42 = vmax.f32 %v521_v40, %v522_v41 }
 0x335   :  { %v524_v43 = vrot.slane %v523_v42, 2 }
 0x337   :  { %v525_v44 = vmax.f32 %v523_v42, %v524_v43 }
 0x339   :  { %v526_v45 = vrot.slane %v525_v44, 1 }
 0x33b   :  { %v527_v46 = vmax.f32 %v525_v44, %v526_v45 }
 0x33d   :  { %v528_v47 = vsub.f32 %v516_v38, %v527_v46  ;;  %v529_v48 = vsub.f32 %v517_v35, %v527_v46 }
 0x33f   :  { %v530_v49 = vmul.f32 1.442695, %v528_v47  ;;  %v532_v50 = vmul.f32 1.442695, %v529_v48 }
 0x341   :  { %2294 = vpow2.f32 %v530_v49 }
 0x342   :  { %2296 = vpow2.f32 %v532_v50 }
 0x34b   :  { %v2295_v51 = vpop.eup %2294 }
 0x34c   :  { %v2297_v52 = vpop.eup %2296  ;;  %v534_v53 = vsel %vm518_vm10, %v2295_v51, 0.0 }
 0x34d   :  { %v535_v54 = vsel %vm518_vm10, %v2297_v52, 0.0 }
 0x34e   :  { %v536_v55 = vadd.f32 %v535_v54, %v534_v53 }
 0x350   :  { %v537_v56 = vrot.slane %v536_v55, 4 }
 0x352   :  { %v538_v57 = vadd.f32 %v537_v56, %v536_v55 }
 0x354   :  { %v539_v58 = vrot.slane %v538_v57, 2 }
 0x356   :  { %v540_v59 = vadd.f32 %v539_v58, %v538_v57 }
 0x358   :  { %v541_v60 = vrot.slane %v540_v59, 1 }
 0x35a   :  { %v542_v61 = vadd.f32 %v541_v60, %v540_v59 }
 0x35c   :  { %2298 = vrcp.f32 %v542_v61 }
 0x366   :  { %v2299_v62 = vpop.eup %2298 }
 0x367   :  { %v544_v63 = vmul.f32 %v2299_v62, %v2295_v51  ;;  %v545_v2 = vmul.f32 %v2299_v62, %v2297_v52 }
 0x369   :  { %2031 = vmatprep.mubr.msk.f32.mxu0 %vm518_vm10, %v544_v63 }
 0x36a   :  { %2032 = vmatmul.mubr.msk.f32.vlgmr.msra.gmra.mrb[0].mxu0 %vm518_vm10, %v545_v2 }
 0x36b   :  { %2185 = vmatpush3.bf16.msra.mxu0 %v2182_v24 }
 0x36c   :  { %2048 = vmatprep.subr.mxu0 %v837_v33 }
 0x3a1   :  { %v2040_v3 = vpop.f32.mrb[8].mxu1 }
 0x3a2   :  { %v720_v4 = vsel %vm2618_vm9, %v2040_v3, -inf  ;;  %v710_v5 = vpop.f32.mrb[9].mxu1 }
 0x3a3   :  { %v722_v6 = vsel %vm518_vm10, %v720_v4, -inf  ;;  %v719_v7 = vsel %vm2622_vm11, %v710_v5, -inf }
 0x3a4   :  { %v721_v8 = vsel %vm518_vm10, %v719_v7, -inf }
 0x3a5   :  { %v723_v9 = vmax.f32 %v721_v8, %v722_v6 }
 0x3a7   :  { %v724_v10 = vrot.slane %v723_v9, 4 }
 0x3a9   :  { %v725_v11 = vmax.f32 %v723_v9, %v724_v10  ;;  %v2064_v12 = vpop.f32.mrb[10].mxu1 }
 0x3aa   :  { %v1092_v13 = vsel %vm2618_vm9, %v2064_v12, -inf  ;;  %v1082_v14 = vpop.f32.mrb[11].mxu1 }
 0x3ab   :  { %v726_v15 = vrot.slane %v725_v11, 2  ;;  %v1094_v16 = vsel %vm518_vm10, %v1092_v13, -inf  ;;  %v1091_v17 = vsel %vm2622_vm11, %v1082_v14, -inf }
 0x3ac   :  { %v1093_v18 = vsel %vm518_vm10, %v1091_v17, -inf }
 0x3ad   :  { %v727_v19 = vmax.f32 %v725_v11, %v726_v15  ;;  %v1095_v20 = vmax.f32 %v1093_v18, %v1094_v16 }
 0x3af   :  { %v728_v21 = vrot.slane %v727_v19, 1  ;;  %v1096_v22 = vrot.slane %v1095_v20, 4 }
 0x3b1   :  { %v729_v23 = vmax.f32 %v727_v19, %v728_v21  ;;  %v1097_v24 = vmax.f32 %v1095_v20, %v1096_v22  ;;  %v2083_v25 = vpop.f32.mrb[12].mxu1 }
 0x3b2   :  { %v1383_v26 = vsel %vm2618_vm9, %v2083_v25, -inf  ;;  %v1373_v27 = vpop.f32.mrb[13].mxu1 }
 0x3b3   :  { %v730_v28 = vsub.f32 %v719_v7, %v729_v23  ;;  %v731_v29 = vsub.f32 %v720_v4, %v729_v23  ;;  %v1098_v30 = vrot.slane %v1097_v24, 2  ;;  %v1385_v31 = vsel %vm518_vm10, %v1383_v26, -inf }
 0x3b4   :  { %v1382_v34 = vsel %vm2622_vm11, %v1373_v27, -inf }
 0x3b5   :  { %v732_v35 = vmul.f32 1.442695, %v730_v28  ;;  %v734_v36 = vmul.f32 1.442695, %v731_v29  ;;  %v1099_v37 = vmax.f32 %v1097_v24, %v1098_v30  ;;  %v1384_v38 = vsel %vm518_vm10, %v1382_v34, -inf }
 0x3b6   :  { %v1386_v39 = vmax.f32 %v1384_v38, %v1385_v31 }
 0x3b7   :  { %2300 = vpow2.f32 %v732_v35  ;;  %v1100_v40 = vrot.slane %v1099_v37, 1 }
 0x3b8   :  { %2302 = vpow2.f32 %v734_v36  ;;  %v1387_v32 = vrot.slane %v1386_v39, 4 }
 0x3b9   :  { %v1101_v41 = vmax.f32 %v1099_v37, %v1100_v40  ;;  %v627_v37 = vld [vmem:[%s2807_s9] sm:$0xff]  ;;  %v2282_v40 = vpop.permute.xlu0 %2281 }
 0x3ba   :  { %v1388_v42 = vmax.f32 %v1386_v39, %v1387_v32  ;;  %v2284_v32 = vunpack.i.h.bf16 %v2282_v40 }
 0x3bb   :  { %v1102_v43 = vsub.f32 %v1091_v17, %v1101_v41  ;;  %v1103_v44 = vsub.f32 %v1092_v13, %v1101_v41  ;;  %v2283_v41 = vunpack.i.l.bf16 %v2282_v40 }
 0x3bc   :  { %v1389_v45 = vrot.slane %v1388_v42, 2 }
 0x3bd   :  { %v1104_v46 = vmul.f32 1.442695, %v1102_v43  ;;  %v1106_v47 = vmul.f32 1.442695, %v1103_v44  ;;  %v2192_v44 = vpack.c.bf16 %v2284_v32, %v2283_v41 }
 0x3be   :  { %v1390_v48 = vmax.f32 %v1388_v42, %v1389_v45  ;;  %v2287_v45 = vpop.permute.xlu1 %2286 }
 0x3bf   :  { %2304 = vpow2.f32 %v1104_v46  ;;  %v1207_v46 = vld [vmem:[%s2807_s9 + $0x10] sm:$0xff] }
 0x3c0   :  { %2306 = vpow2.f32 %v1106_v47  ;;  %v1391_v49 = vrot.slane %v1390_v48, 1  ;;  %v2289_v47 = vunpack.i.h.bf16 %v2287_v45 }
 0x3c1   :  { %v2301_v50 = vpop.eup %2300 }
 0x3c2   :  { %v2303_v51 = vpop.eup %2302  ;;  %v736_v52 = vsel %vm518_vm10, %v2301_v50, 0.0  ;;  %v1392_v53 = vmax.f32 %v1390_v48, %v1391_v49  ;;  %v2288_v48 = vunpack.i.l.bf16 %v2287_v45 }
 0x3c3   :  { %v737_v54 = vsel %vm518_vm10, %v2303_v51, 0.0 }
 0x3c4   :  { %v738_v55 = vadd.f32 %v737_v54, %v736_v52  ;;  %v1393_v56 = vsub.f32 %v1382_v34, %v1392_v53  ;;  %v1394_v57 = vsub.f32 %v1383_v26, %v1392_v53  ;;  %v1894_v54 = vld [vmem:[%s2808_s10] ss:$0 sm:$0xff] }
 0x3c6   :  { %v739_v58 = vrot.slane %v738_v55, 4  ;;  %v1395_v59 = vmul.f32 1.442695, %v1393_v56  ;;  %v1397_v60 = vmul.f32 1.442695, %v1394_v57 }
 0x3c8   :  { %v740_v61 = vadd.f32 %v739_v58, %v738_v55  ;;  %2308 = vpow2.f32 %v1395_v59 }
 0x3c9   :  { %v2305_v62 = vpop.eup %2304  ;;  %2310 = vpow2.f32 %v1397_v60 }
 0x3ca   :  { %v2307_v63 = vpop.eup %2306  ;;  %v741_v2 = vrot.slane %v740_v61, 2  ;;  %v1108_v3 = vsel %vm518_vm10, %v2305_v62, 0.0 }
 0x3cb   :  { %v1109_v4 = vsel %vm518_vm10, %v2307_v63, 0.0 }
 0x3cc   :  { %v742_v5 = vadd.f32 %v741_v2, %v740_v61  ;;  %v1110_v6 = vadd.f32 %v1109_v4, %v1108_v3 }
 0x3ce   :  { %v743_v7 = vrot.slane %v742_v5, 1  ;;  %v1111_v8 = vrot.slane %v1110_v6, 4 }
 0x3d0   :  { %v1112_v9 = vadd.f32 %v1111_v8, %v1110_v6  ;;  %v744_v10 = vadd.f32 %v743_v7, %v742_v5 }
 0x3d2   :  { %v2309_v11 = vpop.eup %2308  ;;  %v1113_v12 = vrot.slane %v1112_v9, 2  ;;  %2312 = vrcp.f32 %v744_v10  ;;  %v1638_v10 = vld [vmem:[%s2811_s13 + $0x8] sm:$0xff] }
 0x3d3   :  { %v2311_v13 = vpop.eup %2310  ;;  %v1399_v14 = vsel %vm518_vm10, %v2309_v11, 0.0 }
 0x3d4   :  { %v1114_v15 = vadd.f32 %v1113_v12, %v1112_v9  ;;  %v1400_v16 = vsel %vm518_vm10, %v2311_v13, 0.0  ;;  %v1637_v9 = vld [vmem:[%s2811_s13] sm:$0xff]  ;;  %v1639_v12 = vld [vmem:[%s2811_s13 + $0x10] sm:$0xff] }
 0x3d5   :  { %v1401_v17 = vadd.f32 %v1400_v16, %v1399_v14  ;;  %v1732_v16 = vld [vmem:[%s2813_s15 + $0x8] sm:$0xff] }
 0x3d6   :  { %v1115_v18 = vrot.slane %v1114_v15, 1 }
 0x3d7   :  { %v1402_v19 = vrot.slane %v1401_v17, 4 }
 0x3d8   :  { %v1116_v20 = vadd.f32 %v1115_v18, %v1114_v15  ;;  %v1731_v15 = vld [vmem:[%s2813_s15] sm:$0xff] }
 0x3d9   :  { %v1403_v21 = vadd.f32 %v1402_v19, %v1401_v17  ;;  %v1733_v17 = vld [vmem:[%s2813_s15 + $0x10] sm:$0xff]  ;;  %v2214_v18 = vpack.c.bf16 %v1732_v16, %v1731_v15  ;;  %v1734_v19 = vld [vmem:[%s2813_s15 + $0x18] sm:$0xff] }
 0x3da   :  { %2314 = vrcp.f32 %v1116_v20  ;;  %v2218_v20 = vpack.c.bf16 %v1734_v19, %v1733_v17 }
 0x3db   :  { %v1404_v22 = vrot.slane %v1403_v21, 2 }
 0x3dc   :  { %v2313_v23 = vpop.eup %2312 }
 0x3dd   :  { %v1405_v24 = vadd.f32 %v1404_v22, %v1403_v21  ;;  %v746_v25 = vmul.f32 %v2313_v23, %v2301_v50  ;;  %v747_v26 = vmul.f32 %v2313_v23, %v2303_v51  ;;  %v1498_v51 = vld [vmem:[%s2807_s9 + $0x18] sm:$0xff]  ;;  %v1735_v21 = vld [vmem:[%s2813_s15 + $0x20] sm:$0xff]  ;;  %v1736_v22 = vld [vmem:[%s2813_s15 + $0x28] sm:$0xff] }
 0x3de   :  { %v2222_v23 = vpack.c.bf16 %v1736_v22, %v1735_v21 }
 0x3df   :  { %v1406_v27 = vrot.slane %v1405_v24, 1  ;;  %2045 = vmatprep.mubr.msk.f32.mxu0 %vm518_vm10, %v746_v25  ;;  %v1738_v25 = vld [vmem:[%s2813_s15 + $0x38] sm:$0xff] }
 0x3e0   :  { %2046 = vmatmul.mubr.msk.f32.vlgmr.msra.gmra.mrb[2].mxu0 %vm518_vm10, %v747_v26 }
 0x3e1   :  { %2049 = vmatpush3.msra.mxu0 %v837_v33  ;;  %v1407_v28 = vadd.f32 %v1406_v27, %v1405_v24  ;;  %v2202_v33 = vpack.c.bf16 %v2289_v47, %v2288_v48  ;;  %v1737_v24 = vld [vmem:[%s2813_s15 + $0x30] sm:$0xff]  ;;  %v1739_v27 = vld [vmem:[%s2813_s15 + $0x40] sm:$0xff] }
 0x3e2   :  { %2053 = vmatprep.subr.mxu0 %v627_v37  ;;  %v2226_v26 = vpack.c.bf16 %v1738_v25, %v1737_v24 }
 0x3e3   :  { %2316 = vrcp.f32 %v1407_v28  ;;  %v1740_v28 = vld [vmem:[%s2813_s15 + $0x48] sm:$0xff] }
 0x3e4   :  { %v2315_v29 = vpop.eup %2314 }
 0x3e5   :  { %v1118_v30 = vmul.f32 %v2315_v29, %v2305_v62  ;;  %v1119_v31 = vmul.f32 %v2315_v29, %v2307_v63  ;;  %v2230_v29 = vpack.c.bf16 %v1740_v28, %v1739_v27 }
 0x3ed   :  { %v2317_v34 = vpop.eup %2316 }
 0x3ee   :  { %v1409_v35 = vmul.f32 %v2317_v34, %v2309_v11  ;;  %v1410_v36 = vmul.f32 %v2317_v34, %v2311_v13  ;;  %v2206_v11 = vpack.c.bf16 %v1638_v10, %v1637_v9  ;;  %v1640_v13 = vld [vmem:[%s2811_s13 + $0x18] sm:$0xff] }
 0x3ef   :  { %v2210_v14 = vpack.c.bf16 %v1640_v13, %v1639_v12 }
 0x3f0   :  { %2207 = vmatprep.subr.bf16.mxu1 %v2206_v11 }
 0x3f1   :  { %2209 = vmatpush3.bf16.msra.mxu1 %v2206_v11 }
 0x3f2   :  { %2211 = vmatprep.subr.bf16.mxu1 %v2210_v14 }
 0x3f5   :  { %2213 = vmatpush3.bf16.msra.mxu1 %v2210_v14 }
 0x43d   :  { %v2033_v38 = vpop.f32.mrb[0].mxu0 }
 0x43e   :  { %v618_v39 = vpop.f32.mrb[1].mxu0 }
 0x4b3   :  { %v2047_v42 = vpop.f32.mrb[2].mxu0 }
 0x4b4   :  { %v828_v43 = vpop.f32.mrb[3].mxu0 }
 0x4b5   :  { %2050 = vmatprep.mubr.msk.f32.mxu0 %vm428_vm1, %v828_v43 }
 0x4b6   :  { %2051 = vmatmul.mubr.msk.f32.vlgmr.msra.gmra.mrb[4].mxu0 %vm428_vm1, %v2047_v42 }
 0x4b7   :  { %2054 = vmatpush3.msra.mxu0 %v627_v37  ;;  %2055 = vmatprep.mubr.msk.f32.mxu0 %vm428_vm1, %v618_v39 }
 0x4b8   :  { %2193 = vmatprep.subr.bf16.mxu0 %v2192_v44 }
 0x4be   :  { %2056 = vmatmul.mubr.msk.f32.vlgmr.msra.gmra.mrb[4].mxu0 %vm428_vm1, %v2033_v38 }
 0x4bf   :  { %2195 = vmatpush3.bf16.msra.mxu0 %v2192_v44  ;;  %2069 = vmatprep.mubr.msk.f32.mxu0 %vm518_vm10, %v1118_v30  ;;  %v1741_v30 = vld [vmem:[%s2813_s15 + $0x50] sm:$0xff]  ;;  %v1895_v44 = vld [vmem:[%s2809_s11] ss:$0 sm:$0xff] }
 0x4c0   :  { %2072 = vmatprep.subr.mxu0 %v1207_v46 }
 0x4c2   :  { %2070 = vmatmul.mubr.msk.f32.vlgmr.msra.gmra.mrb[6].mxu0 %vm518_vm10, %v1119_v31  ;;  %v1742_v31 = vld [vmem:[%s2813_s15 + $0x58] sm:$0xff] }
 0x4c3   :  { %2073 = vmatpush3.msra.mxu0 %v1207_v46  ;;  %v2234_v34 = vpack.c.bf16 %v1742_v31, %v1741_v30  ;;  %v1896_v46 = vld [vmem:[%s2810_s12] ss:$0 sm:$0xff] }
 0x4c4   :  { %2203 = vmatprep.subr.bf16.mxu0 %v2202_v33 }
 0x595   :  { %v2071_v49 = vpop.f32.mrb[6].mxu0 }
 0x596   :  { %v1198_v50 = vpop.f32.mrb[7].mxu0 }
 0x597   :  { %2074 = vmatprep.mubr.msk.f32.mxu0 %vm428_vm1, %v1198_v50 }
 0x598   :  { %2075 = vmatmul.mubr.msk.f32.vlgmr.msra.gmra.mrb[4].mxu0 %vm428_vm1, %v2071_v49 }
 0x599   :  { %2205 = vmatpush3.bf16.msra.mxu0 %v2202_v33  ;;  %2088 = vmatprep.mubr.msk.f32.mxu0 %vm518_vm10, %v1409_v35  ;;  %v1743_v35 = vld [vmem:[%s2813_s15 + $0x60] sm:$0xff] }
 0x59a   :  { %2091 = vmatprep.subr.mxu0 %v1498_v51 }
 0x59c   :  { %2089 = vmatmul.mubr.msk.f32.vlgmr.msra.gmra.mrb[8].mxu0 %vm518_vm10, %v1410_v36  ;;  %v1744_v36 = vld [vmem:[%s2813_s15 + $0x68] sm:$0xff] }
 0x59d   :  { %2092 = vmatpush3.msra.mxu0 %v1498_v51  ;;  %v2238_v37 = vpack.c.bf16 %v1744_v36, %v1743_v35 }
 0x59e   :  { %2215 = vmatprep.subr.bf16.mxu0 %v2214_v18 }
 0x66f   :  { %v2090_v52 = vpop.f32.mrb[8].mxu0 }
 0x670   :  { %v1489_v53 = vpop.f32.mrb[9].mxu0 }
 0x671   :  { %2093 = vmatprep.mubr.msk.f32.mxu0 %vm428_vm1, %v1489_v53  ;;  %v1746_v53 = vld [vmem:[%s2813_s15 + $0x78] sm:$0xff] }
 0x672   :  { %2094 = vmatmul.mubr.msk.f32.vlgmr.msra.gmra.mrb[4].mxu0 %vm428_vm1, %v2090_v52  ;;  %v1745_v52 = vld [vmem:[%s2813_s15 + $0x70] sm:$0xff]  ;;  %s2401_s15 = smov [#allocation7]  }
 0x673   :  { %2217 = vmatpush3.bf16.msra.mxu0 %v2214_v18  ;;  %s1838_s26 = sshll.u32 %s2401_s15, 4  ;;  %s1839_s26 = int_to_ptr.vmem [resolvable:$true] %s1838_s26 }
 0x674   :  { %2219 = vmatprep.subr.bf16.mxu0 %v2218_v20  ;;  %s2366_s27 = scalar_lea.vmem %s1839_s26, 256  ;;  %p2371_p3 = scmp.lt.s32.totalorder %s1839_s26, %s1839_s26 }
 0x675   :  { %p2367_p2 = scmp.ne.s32.totalorder %s1839_s26, %s2366_s27  ;;  %p2372_p4 = scmp.lt.s32.totalorder %s2366_s27, %s2366_s27 }
 0x677   :  { %2221 = vmatpush3.bf16.msra.mxu0 %v2218_v20  ;;  %p2373_p5 = por %p2372_p4, %p2371_p3 }
 0x678   :  { %2223 = vmatprep.subr.bf16.mxu0 %v2222_v23 }
 0x679   :  { %p2374_p6 = pnand %p2373_p5, %p2367_p2 }
 0x67b   :  { %2225 = vmatpush3.bf16.msra.mxu0 %v2222_v23 }
 0x67c   :  { %2227 = vmatprep.subr.bf16.mxu0 %v2226_v26 }
 0x67f   :  { %2229 = vmatpush3.bf16.msra.mxu0 %v2226_v26 }
 0x680   :  { %2231 = vmatprep.subr.bf16.mxu0 %v2230_v29 }
 0x683   :  { %2233 = vmatpush3.bf16.msra.mxu0 %v2230_v29 }
 0x684   :  { %2235 = vmatprep.subr.bf16.mxu0 %v2234_v34 }
 0x687   :  { %2237 = vmatpush3.bf16.msra.mxu0 %v2234_v34 }
 0x688   :  { %2239 = vmatprep.subr.bf16.mxu0 %v2238_v37 }
 0x68b   :  { %2241 = vmatpush3.bf16.msra.mxu0 %v2238_v37 }
 0x745   :  { %v2095_v55 = vpop.f32.mrb[4].mxu0 }
 0x746   :  { %v1590_v56 = vadd.f32 %v2095_v55, %v1894_v54  ;;  %v1571_v57 = vpop.f32.mrb[5].mxu0  ;;  %v1897_v55 = vld [vmem:[#allocation5] ss:$0 sm:$0xff] }
 0x747   :  { %v1589_v58 = vadd.f32 %v1894_v54, %v1571_v57  ;;  %v2242_v54 = vpack.c.bf16 %v1746_v53, %v1745_v52 }
 0x748   :  { %v2690_v59 = vadd.f32 %v1590_v56, %v2521_v1 }
 0x749   :  { %v2693_v60 = vadd.f32 %v1589_v58, %v2519_v0  ;;  %2243 = vmatprep.subr.bf16.mxu0 %v2242_v54 }
 0x74a   :  { %v1598_v61 = vsel %vm87_vm0, %v2690_v59, 0.0  ;;  %2245 = vmatpush3.bf16.msra.mxu0 %v2242_v54 }
 0x74b   :  { %1599 = vadd.xlane.f32.xlu1 %v1598_v61  ;;  %v1595_v62 = vsel %vm87_vm0, %v2693_v60, 0.0 }
 0x74c   :  { %1596 = vadd.xlane.f32.xlu0 %v1595_v62 }
 0x7d8   :  { %v1600_v63 = vpop.xlane.xlu1 %1599 }
 0x7d9   :  { %v1602_v2 = vmul.f32 0.03125, %v1600_v63  ;;  %v1597_v3 = vpop.xlane.xlu0 %1596 }
 0x7da   :  { %v1601_v4 = vmul.f32 0.03125, %v1597_v3 }
 0x7db   :  { %v2700_v5 = vsub.f32 %v2690_v59, %v1602_v2  ;;  %v1900_v2 = vld [vmem:[%s2814_s16] ss:$0 sm:$0xff] }
 0x7dc   :  { %v1603_v1 = vsub.f32 %v2693_v60, %v1601_v4 }
 0x7dd   :  { %v1606_v7 = vmul.f32 %v2700_v5, %v2700_v5 }
 0x7de   :  { %v1605_v6 = vmul.f32 %v1603_v1, %v1603_v1 }
 0x7df   :  { %v1610_v8 = vsel %vm87_vm0, %v1606_v7, 0.0 }
 0x7e0   :  { %v1607_v0 = vsel %vm87_vm0, %v1605_v6, 0.0 }
 0x7e1   :  { %1608 = vadd.xlane.f32.xlu0 %v1607_v0 }
 0x7e5   :  { %1611 = vadd.xlane.f32.xlu0 %v1610_v8 }
 0x86e   :  { %v1609_v38 = vpop.xlane.xlu0 %1608 }
 0x86f   :  { %v1613_v39 = vmul.f32 0.03125, %v1609_v38 }
 0x871   :  { %v1615_v40 = vadd.f32 1e-05, %v1613_v39 }
 0x872   :  { %v1612_v32 = vpop.xlane.xlu0 %1611 }
 0x873   :  { %2318 = vrsqrt.f32 %v1615_v40  ;;  %v1614_v41 = vmul.f32 0.03125, %v1612_v32 }
 0x875   :  { %v1616_v42 = vadd.f32 1e-05, %v1614_v41 }
 0x877   :  { %2320 = vrsqrt.f32 %v1616_v42 }
 0x87d   :  { %v2319_v43 = vpop.eup %2318 }
 0x87e   :  { %v1619_v45 = vmul.f32 %v2319_v43, %v1603_v1 }
 0x880   :  { %v1627_v47 = vmul.f32 %v1895_v44, %v1619_v45 }
 0x881   :  { %v2321_v48 = vpop.eup %2320 }
 0x882   :  { %v1620_v33 = vmul.f32 %v2321_v48, %v2700_v5  ;;  %v1635_v49 = vadd.f32 %v1896_v46, %v1627_v47 }
 0x884   :  { %v1628_v50 = vmul.f32 %v1895_v44, %v1620_v33  ;;  %2104 = vmatprep.mubr.msk.f32.mxu1 %vm87_vm0, %v1635_v49 }
 0x886   :  { %v1636_v51 = vadd.f32 %v1896_v46, %v1628_v50 }
 0x888   :  { %2105 = vmatmul.mubr.msk.f32.vlgmr.msra.gmra.mrb[14].mxu1 %vm87_vm0, %v1636_v51 }
 0x95b   :  { %v2106_v56 = vpop.f32.mrb[14].mxu1 }
 0x95c   :  { %v1726_v57 = vadd.f32 %v2106_v56, %v1897_v55  ;;  %v1720_v58 = vpop.f32.mrb[15].mxu1 }
 0x95d   :  { %v1721_v61 = vadd.f32 %v1897_v55, %v1720_v58 }
 0x95e   :  { %v1730_v63 = vmax.f32 %v1726_v57, 0.0 }
 0x95f   :  { %v1729_v62 = vmax.f32 %v1721_v61, 0.0 }
 0x961   :  { %2139 = vmatprep.mubr.f32.mxu0 %v1729_v62 }
 0x962   :  { %2140 = vmatmul.mubr.f32.vlgmr.msra.gmra.mrb[10].mxu0 %v1730_v63 }
 0xa35   :  { %v2141_v3 = vpop.f32.mrb[10].mxu0 }
 0xa36   :  { %v1826_v4 = vadd.f32 %v2141_v3, %v1900_v2  ;;  %v1820_v5 = vpop.f32.mrb[11].mxu0 }
 0xa37   :  { %v1821_v1 = vadd.f32 %v1900_v2, %v1820_v5 }
 0xa38   :  { %v1830_v6 = vadd.f32 %v1826_v4, %v2690_v59 }
 0xa39   :  { %v1829_v0 = vadd.f32 %v1821_v1, %v2693_v60 }
 0xa3a   :  { %1832 = vst.msk [vmem:[#allocation7 + $0x8] sm:$0xff] %vm87_vm0, %v1830_v6 }
 0xa3b   :  { %1831 = vst.msk [vmem:[#allocation7] sm:$0xff] %vm87_vm0, %v1829_v0 }
 0xa3c   :  { %2377 = shalt.err (!%p2374_p6)
}
 0xa3d   :  { %s2829_s2 = sld [smem:[#allocation13_spill]] }
 0xa43   :  { %s2378_s0 = scalar_lea.hbm %s2829_s2, 256 }
 0xa44   :  { %p2379_p7 = scmp.ne.s32.totalorder %s2829_s2, %s2378_s0  ;;  %p2382_p8 = scmp.lt.u32.totalorder %s2378_s0, %s2829_s2 }
 0xa46   :  { %p2384_p9 = pnand %p2382_p8, %p2379_p7 }
 0xa48   :  { %2387 = shalt.err (!%p2384_p9)
}
 0xa49   :  { %1844 = dma.vmem_to_hbm [thread:$0]  %s1839_s26, 256, %s2829_s2, [#allocation4], %s2395_s20, %s2395_s20, %s2396_s21  }
 0xa4a   :  { %2392 = dma.done.wait [#allocation4], 256  }
 0xa4b   :  { %2393 = vsyncadd [#allocation4], 4294967040 }
 0xa4c   :  { %1848 = vsyncpa [#allocation3], 1 }
 0xa4d   :  { %1849 = vsyncpa [#allocation6], 1 }
 0xa4e   :  { %1850 = vsyncpa [#allocation4], 1 }

</bundles_post_ra>
